<compile_context>
chip_gen: v7x
topology: tpu7x:2x2x1
jax: 0.10.0
libtpu: 0.0.40
codegen_flags: <defaults>
</compile_context>

<pallas_src>
import jax
import jax.numpy as jnp
from jax import lax
from jax.experimental import pallas as pl
from jax.experimental.pallas import tpu as pltpu


def _round_up(x, m):
    return ((x + m - 1) // m) * m


def _fc_classblock_kernel(x_ref, w1_ref, shift_ref, w2_ref, b2_ref,
                          logits_ref, f_ref):
    # --- cast activation to the MXU compute dtype in-kernel (no wrapper pass) ---
    x = x_ref[...].astype(w1_ref.dtype)

    # --- Linear1 with BN (eval) + b1 pre-folded into W1'/shift' (MXU, f32 acc) ---
    z = jnp.dot(x, w1_ref[...], preferred_element_type=jnp.float32) + shift_ref[...]

    # --- L2-normalized feature branch: f = z / (||z|| + 1e-8)  (XLU + EUP) ---
    sq = jnp.sum(z * z, axis=1, keepdims=True)          # (TILE_B, 1)
    norm = jnp.sqrt(sq) + 1e-8                           # matches reference exactly
    f_ref[...] = (z / norm).astype(f_ref.dtype)          # bf16 writeback

    # --- classifier Linear (dropout = identity in eval)  (MXU, f32 acc) ---
    logits_ref[...] = (
        jnp.dot(z.astype(w2_ref.dtype), w2_ref[...],
                preferred_element_type=jnp.float32) + b2_ref[...]
    )


def _estimate_vmem_bytes(tile_b, in_dim, nb_pad, nc_pad, x_bytes, w_bytes=2):
    # Streamed per-step tiles, double-buffered: x (native dtype), logits (f32), f (bf16).
    streamed = 2 * tile_b * (in_dim * x_bytes + nc_pad * 4 + nb_pad * 2)
    # Resident operands, single-buffered (pl.Buffered(1)).
    resident = (in_dim * nb_pad + nb_pad * nc_pad) * w_bytes + (nb_pad + nc_pad) * 4
    # In-kernel live intermediates: bf16 x copy, z (f32) and its bf16 recast.
    live = tile_b * (in_dim * 2 + nb_pad * (4 + 2))
    return streamed + resident + live


def prepare_params(params, *, eps=1e-5, compute_dtype=jnp.bfloat16):
    """One-time prep (outside the serving path): fold BN, transpose, pad, cast."""
    w1 = params["w1"]                      # (nb, in_dim)
    w2 = params["w2"]                      # (nc, nb)
    nb, in_dim = w1.shape
    nc = w2.shape[0]

    inv_std = lax.rsqrt(params["bn_running_var"] + eps)
    scale = params["bn_gamma"] * inv_std                       # (nb,)
    shift = (params["bn_beta"] - params["bn_running_mean"] * scale
             + scale * params["b1"])                           # (nb,)

    w1_eff = (w1 * scale[:, None]).T                           # (in_dim, nb), f32
    w2_t = w2.T                                                # (nb, nc), f32

    # Only the output (lane) dims are zero-padded to 128 for lane-dense stores;
    # K (= in_dim) stays natural: a block dim equal to the full array dim is legal.
    nb_pad = _round_up(nb, 128)
    nc_pad = _round_up(nc, 128)

    w1_p = jnp.zeros((in_dim, nb_pad), compute_dtype
                     ).at[:, :nb].set(w1_eff.astype(compute_dtype))
    w2_p = jnp.zeros((nb_pad, nc_pad), compute_dtype
                     ).at[:nb, :nc].set(w2_t.astype(compute_dtype))
    shift_p = jnp.zeros((1, nb_pad), jnp.float32).at[0, :nb].set(shift)
    b2_p = jnp.zeros((1, nc_pad), jnp.float32).at[0, :nc].set(params["b2"])

    return dict(w1=w1_p, w2=w2_p, shift=shift_p, b2=b2_p,
                in_dim=in_dim, nb=nb, nc=nc, nb_pad=nb_pad, nc_pad=nc_pad)


def fc_classblock_forward(x, prepared, *, tile_b=None):
    """x: (B, input_dim). Returns (logits (B, class_num) f32, f (B, num_bottleneck) bf16)."""
    B, in_dim = x.shape
    assert in_dim == prepared["in_dim"]
    nb_pad, nc_pad = prepared["nb_pad"], prepared["nc_pad"]
    nb, nc = prepared["nb"], prepared["nc"]

    # Generation-aware batch tile:
    #   v5e: 128 fills the 4x128x128 MXU M dim.
    #   v6e/v7x (2x256x256 MXU): 256 once the batch is big enough that the
    #   "parallel" grid still has >= 2 steps (keeps both v7x TensorCores busy).
    if tile_b is None:
        tile_b = 256 if B >= 512 else 128
    if tile_b > B:
        tile_b = B          # single block == full batch dim (always a legal block)

    grid = (pl.cdiv(B, tile_b),)   # ragged final tile handled by Pallas masking

    x_bytes = jnp.dtype(x.dtype).itemsize
    est = _estimate_vmem_bytes(tile_b, in_dim, nb_pad, nc_pad, x_bytes)
    vmem_limit = int(min(max(16 << 20, est + (8 << 20)), 100 << 20))

    resident = pl.Buffered(1)   # constant index_map -> no double buffer, no re-DMA

    logits_p, f_p = pl.pallas_call(
        _fc_classblock_kernel,
        out_shape=(
            jax.ShapeDtypeStruct((B, nc_pad), jnp.float32),    # logits
            jax.ShapeDtypeStruct((B, nb_pad), jnp.bfloat16),   # f (halved writeback)
        ),
        grid=grid,
        in_specs=[
            pl.BlockSpec((tile_b, in_dim), lambda i: (i, 0)),                         # x tile
            pl.BlockSpec((in_dim, nb_pad), lambda i: (0, 0), pipeline_mode=resident), # W1'
            pl.BlockSpec((1, nb_pad), lambda i: (0, 0), pipeline_mode=resident),      # shift'
            pl.BlockSpec((nb_pad, nc_pad), lambda i: (0, 0), pipeline_mode=resident), # W2^T
            pl.BlockSpec((1, nc_pad), lambda i: (0, 0), pipeline_mode=resident),      # b2
        ],
        out_specs=(
            pl.BlockSpec((tile_b, nc_pad), lambda i: (i, 0)),   # logits tile
            pl.BlockSpec((tile_b, nb_pad), lambda i: (i, 0)),   # f tile
        ),
        compiler_params=pltpu.CompilerParams(
            dimension_semantics=("parallel",),
            vmem_limit_bytes=vmem_limit,
        ),
    )(x, prepared["w1"], prepared["shift"], prepared["w2"], prepared["b2"])

    return logits_p[:, :nc], f_p[:, :nb]


def init_params(key, input_dim, class_num, num_bottleneck):
    """Deterministic init mirroring weights_init_kaiming / weights_init_classifier."""
    k1, k2, k3 = jax.random.split(key, 3)
    # Linear1: kaiming_normal, mode='fan_out' -> std = sqrt(2 / num_bottleneck)
    w1 = jax.random.normal(k1, (num_bottleneck, input_dim), jnp.float32) * jnp.sqrt(
        2.0 / num_bottleneck)
    b1 = jnp.zeros((num_bottleneck,), jnp.float32)
    # BatchNorm1d: gamma ~ N(1, 0.02), beta = 0, running stats at defaults.
    bn_gamma = 1.0 + 0.02 * jax.random.normal(k2, (num_bottleneck,), jnp.float32)
    bn_beta = jnp.zeros((num_bottleneck,), jnp.float32)
    bn_running_mean = jnp.zeros((num_bottleneck,), jnp.float32)
    bn_running_var = jnp.ones((num_bottleneck,), jnp.float32)
    # Classifier Linear: N(0, 0.001), bias = 0.
    w2 = 0.001 * jax.random.normal(k3, (class_num, num_bottleneck), jnp.float32)
    b2 = jnp.zeros((class_num,), jnp.float32)
    return dict(w1=w1, b1=b1, bn_gamma=bn_gamma, bn_beta=bn_beta,
                bn_running_mean=bn_running_mean, bn_running_var=bn_running_var,
                w2=w2, b2=b2)


def _reference(x, params):
    """Plain-JAX f32 reference (eval-mode PyTorch forward)."""
    y = x @ params["w1"].T + params["b1"]
    eps = 1e-5
    z = params["bn_gamma"] * (y - params["bn_running_mean"]) / jnp.sqrt(
        params["bn_running_var"] + eps) + params["bn_beta"]
    norm = jnp.linalg.norm(z, axis=1, keepdims=True) + 1e-8
    f = z / norm
    logits = z @ params["w2"].T + params["b2"]
    return logits, f


if __name__ == "__main__":
    B, INPUT_DIM, CLASS_NUM, NUM_BOTTLENECK = 8, 64, 16, 512

    key = jax.random.PRNGKey(0)
    kx, kp = jax.random.split(key)
    x = jax.random.normal(kx, (B, INPUT_DIM), jnp.float32)
    params = init_params(kp, INPUT_DIM, CLASS_NUM, NUM_BOTTLENECK)

    prepared = prepare_params(params)   # one-time: BN fold, transpose, pad, bf16 cast

    logits, f = jax.block_until_ready(fc_classblock_forward(x, prepared))

    ref_logits, ref_f = _reference(x, params)
    assert logits.shape == (B, CLASS_NUM) and f.shape == (B, NUM_BOTTLENECK)
    # bf16 MXU operands / bf16 f output with f32 accumulation -> ~1e-2 agreement.
    assert jnp.allclose(logits, ref_logits, atol=1e-2, rtol=1e-2)
    assert jnp.allclose(f.astype(jnp.float32), ref_f, atol=1e-2, rtol=1e-2)

    print("KERNEL_OK")
</pallas_src>

<mosaic_0001>
module attributes {stable_mosaic.version = 11 : i64} {
  func.func @_fc_classblock_kernel(%arg0: i32, %arg1: memref<8x64xf32, #tpu.memory_space<vmem>>, %arg2: memref<64x512xbf16, #tpu.memory_space<vmem>>, %arg3: memref<1x512xf32, #tpu.memory_space<vmem>>, %arg4: memref<512x128xbf16, #tpu.memory_space<vmem>>, %arg5: memref<1x128xf32, #tpu.memory_space<vmem>>, %arg6: memref<8x128xf32, #tpu.memory_space<vmem>>, %arg7: memref<8x512xbf16, #tpu.memory_space<vmem>>) attributes {dimension_semantics = [#tpu.dimension_semantics<parallel>], iteration_bounds = array<i64: 1>, scalar_prefetch = 0 : i64, scratch_operands = 0 : i64, tpu.core_type = #tpu.core_type<tc>, window_params = [{transform_indices = @transform_0, window_bounds = array<i64: 8, 64>}, {pipeline_mode = #tpu.pipeline_mode<synchronous>, transform_indices = @transform_1, window_bounds = array<i64: 64, 512>}, {pipeline_mode = #tpu.pipeline_mode<synchronous>, transform_indices = @transform_2, window_bounds = array<i64: 1, 512>}, {pipeline_mode = #tpu.pipeline_mode<synchronous>, transform_indices = @transform_3, window_bounds = array<i64: 512, 128>}, {pipeline_mode = #tpu.pipeline_mode<synchronous>, transform_indices = @transform_4, window_bounds = array<i64: 1, 128>}, {transform_indices = @transform_5, window_bounds = array<i64: 8, 128>}, {transform_indices = @transform_6, window_bounds = array<i64: 8, 512>}]} {
    %c0 = arith.constant 0 : index
    %c0_0 = arith.constant 0 : index
    %0 = vector.load %arg1[%c0, %c0_0] : memref<8x64xf32, #tpu.memory_space<vmem>>, vector<8x64xf32>
    %1 = arith.truncf %0 : vector<8x64xf32> to vector<8x64xbf16>
    %c0_1 = arith.constant 0 : index
    %c0_2 = arith.constant 0 : index
    %2 = vector.load %arg2[%c0_1, %c0_2] : memref<64x512xbf16, #tpu.memory_space<vmem>>, vector<64x512xbf16>
    %cst = arith.constant dense<0.000000e+00> : vector<8x512xf32>
    %3 = tpu.matmul %1, %2, %cst {dimension_numbers = #tpu.dot_dimension_numbers<[1], [0], [0], [1], [0, 0, 1, 1], [], []>} : vector<8x64xbf16>, vector<64x512xbf16>, vector<8x512xf32> -> vector<8x512xf32>
    %c0_3 = arith.constant 0 : index
    %c0_4 = arith.constant 0 : index
    %4 = vector.load %arg3[%c0_3, %c0_4] : memref<1x512xf32, #tpu.memory_space<vmem>>, vector<1x512xf32>
    %5 = vector.broadcast %4 : vector<1x512xf32> to vector<8x512xf32>
    %6 = arith.addf %3, %5 : vector<8x512xf32>
    %7 = arith.mulf %6, %6 : vector<8x512xf32>
    %cst_5 = arith.constant dense<0.000000e+00> : vector<8xf32>
    %8 = vector.multi_reduction <add>, %7, %cst_5 [1] : vector<8x512xf32> to vector<8xf32>
    %9 = vector.shape_cast %8 : vector<8xf32> to vector<8x1xf32>
    %10 = math.sqrt %9 : vector<8x1xf32>
    %cst_6 = arith.constant 9.99999993E-9 : f32
    %11 = vector.broadcast %cst_6 : f32 to vector<8x1xf32>
    %12 = arith.addf %10, %11 : vector<8x1xf32>
    %13 = vector.broadcast %12 : vector<8x1xf32> to vector<8x512xf32>
    %14 = arith.divf %6, %13 : vector<8x512xf32>
    %15 = arith.truncf %14 : vector<8x512xf32> to vector<8x512xbf16>
    %c0_7 = arith.constant 0 : index
    %c0_8 = arith.constant 0 : index
    %16 = vector.load %arg7[%c0_7, %c0_8] : memref<8x512xbf16, #tpu.memory_space<vmem>>, vector<8x512xbf16>
    tpu.vector_store %arg7[%c0_7, %c0_8], %15 {strides = array<i32>} : memref<8x512xbf16, #tpu.memory_space<vmem>>, vector<8x512xbf16>,
    %17 = arith.truncf %6 : vector<8x512xf32> to vector<8x512xbf16>
    %c0_9 = arith.constant 0 : index
    %c0_10 = arith.constant 0 : index
    %18 = vector.load %arg4[%c0_9, %c0_10] : memref<512x128xbf16, #tpu.memory_space<vmem>>, vector<512x128xbf16>
    %cst_11 = arith.constant dense<0.000000e+00> : vector<8x128xf32>
    %19 = tpu.matmul %17, %18, %cst_11 {dimension_numbers = #tpu.dot_dimension_numbers<[1], [0], [0], [1], [0, 0, 1, 1], [], []>} : vector<8x512xbf16>, vector<512x128xbf16>, vector<8x128xf32> -> vector<8x128xf32>
    %c0_12 = arith.constant 0 : index
    %c0_13 = arith.constant 0 : index
    %20 = vector.load %arg5[%c0_12, %c0_13] : memref<1x128xf32, #tpu.memory_space<vmem>>, vector<1x128xf32>
    %21 = vector.broadcast %20 : vector<1x128xf32> to vector<8x128xf32>
    %22 = arith.addf %19, %21 : vector<8x128xf32>
    %c0_14 = arith.constant 0 : index
    %c0_15 = arith.constant 0 : index
    %23 = vector.load %arg6[%c0_14, %c0_15] : memref<8x128xf32, #tpu.memory_space<vmem>>, vector<8x128xf32>
    tpu.vector_store %arg6[%c0_14, %c0_15], %22 {strides = array<i32>} : memref<8x128xf32, #tpu.memory_space<vmem>>, vector<8x128xf32>,
    return
  }
  func.func @transform_0(%arg0: i32) -> (i32, i32) {
    %c0_i32 = arith.constant 0 : i32
    %c0_i32_0 = arith.constant 0 : i32
    return %arg0, %c0_i32 : i32, i32
  }
  func.func @transform_1(%arg0: i32) -> (i32, i32) {
    %c0_i32 = arith.constant 0 : i32
    %c0_i32_0 = arith.constant 0 : i32
    %c0_i32_1 = arith.constant 0 : i32
    return %c0_i32, %c0_i32_0 : i32, i32
  }
  func.func @transform_2(%arg0: i32) -> (i32, i32) {
    %c0_i32 = arith.constant 0 : i32
    %c0_i32_0 = arith.constant 0 : i32
    %c0_i32_1 = arith.constant 0 : i32
    return %c0_i32, %c0_i32_0 : i32, i32
  }
  func.func @transform_3(%arg0: i32) -> (i32, i32) {
    %c0_i32 = arith.constant 0 : i32
    %c0_i32_0 = arith.constant 0 : i32
    %c0_i32_1 = arith.constant 0 : i32
    return %c0_i32, %c0_i32_0 : i32, i32
  }
  func.func @transform_4(%arg0: i32) -> (i32, i32) {
    %c0_i32 = arith.constant 0 : i32
    %c0_i32_0 = arith.constant 0 : i32
    %c0_i32_1 = arith.constant 0 : i32
    return %c0_i32, %c0_i32_0 : i32, i32
  }
  func.func @transform_5(%arg0: i32) -> (i32, i32) {
    %c0_i32 = arith.constant 0 : i32
    %c0_i32_0 = arith.constant 0 : i32
    return %arg0, %c0_i32 : i32, i32
  }
  func.func @transform_6(%arg0: i32) -> (i32, i32) {
    %c0_i32 = arith.constant 0 : i32
    %c0_i32_0 = arith.constant 0 : i32
    return %arg0, %c0_i32 : i32, i32
  }
}

</mosaic_0001>

<bundles_post_ra>
// kernel: tpu_custom_call.1
= control target key start
LH: loop header
LB: loop body
LE: loop exit
PB: predicated region body
PF: predicated region fallthrough
CT: control target
= control target key end

     0   :  { %12 = vsyncpa [#allocation3], 0  ;;  %s1086_s0 = inlined_call_operand.hbm [shape: f32[8,64], index: 0, kind: input, shape index: {}]   ;;  %s1087_s1 = inlined_call_operand.hbm [shape: bf16[64,512], index: 1, kind: input, shape index: {}]   ;;  %s1088_s2 = inlined_call_operand.vmem [shape: f32[1,512], index: 2, kind: input, shape index: {}]   ;;  %s1089_s3 = inlined_call_operand.hbm [shape: bf16[512,128], index: 3, kind: input, shape index: {}]   ;;  %s1090_s4 = inlined_call_operand.vmem [shape: f32[1,128], index: 4, kind: input, shape index: {}]   ;;  %s1091_s5 = inlined_call_operand.hbm [shape: f32[8,128], index: 5, kind: output, shape index: {0}]   ;;  %s1092_s6 = inlined_call_operand.hbm [shape: bf16[8,512], index: 6, kind: output, shape index: {1}]  }
   0x1   :  { %13 = vsyncpa [#allocation6], 0 }
   0x2   :  { %14 = vsyncpa [#allocation4], 0 }
   0x3   :  { %15 = vsyncpa [#allocation10], 0  ;;  %s975_s21 = smov [#allocation5]   ;;  %s857_s25 = scalar_lea.hbm %s1087_s1, 2048 }
   0x4   :  { %s31_s22 = sshll.u32 %s975_s21, 4  ;;  %p858_p0 = scmp.ne.s32.totalorder %s1087_s1, %s857_s25  ;;  %s32_s22 = int_to_ptr.vmem [resolvable:$true] %s31_s22 }
   0x5   :  { %p861_p1 = scmp.lt.u32.totalorder %s857_s25, %s1087_s1 }
   0x7   :  { %p863_p2 = pnand %p861_p1, %p858_p0 }
   0x9   :  { %866 = shalt.err (!%p863_p2)
}
   0xa   :  { %s867_s30 = scalar_lea.vmem %s32_s22, 2048  ;;  %p872_p4 = scmp.lt.s32.totalorder %s32_s22, %s32_s22 }
   0xb   :  { %p868_p3 = scmp.ne.s32.totalorder %s32_s22, %s867_s30  ;;  %p873_p5 = scmp.lt.s32.totalorder %s867_s30, %s867_s30 }
   0xd   :  { %p874_p6 = por %p873_p5, %p872_p4 }
   0xf   :  { %p875_p7 = pnand %p874_p6, %p868_p3 }
  0x11   :  { %878 = shalt.err (!%p875_p7)
}
  0x12   :  { %s976_s7 = smov 256   ;;  %s977_s8 = smov 16  }
  0x13   :  { %37 = dma.hbm_to_vmem [thread:$0]  %s1087_s1, 2048, %s32_s22, [#allocation6], %s976_s7, %s976_s7, %s977_s8  }
  0x14   :  { %s978_s11 = smov [#allocation2]   ;;  %s979_s13 = smov [#allocation7]  }
  0x15   :  { %s22_s12 = sshll.u32 %s978_s11, 4  ;;  %s45_s14 = sshll.u32 %s979_s13, 4  ;;  %s23_s12 = int_to_ptr.vmem [resolvable:$true] %s22_s12  ;;  %s46_s14 = int_to_ptr.vmem [resolvable:$true] %s45_s14 }
  0x16   :  { %s879_s17 = scalar_lea.hbm %s1086_s0, 128 }
  0x17   :  { %p880_p8 = scmp.ne.s32.totalorder %s1086_s0, %s879_s17  ;;  %p883_p9 = scmp.lt.u32.totalorder %s879_s17, %s1086_s0 }
  0x19   :  { %p885_p10 = pnand %p883_p9, %p880_p8 }
  0x1b   :  { %888 = shalt.err (!%p885_p10)
}
  0x1c   :  { %s889_s1 = scalar_lea.vmem %s23_s12, 128  ;;  %p894_p12 = scmp.lt.s32.totalorder %s23_s12, %s23_s12 }
  0x1d   :  { %p890_p11 = scmp.ne.s32.totalorder %s23_s12, %s889_s1  ;;  %p895_p13 = scmp.lt.s32.totalorder %s889_s1, %s889_s1 }
  0x1f   :  { %p896_p0 = por %p895_p13, %p894_p12 }
  0x21   :  { %p897_p1 = pnand %p896_p0, %p890_p11 }
  0x23   :  { %900 = shalt.err (!%p897_p1)
}
  0x24   :  { %25 = dma.hbm_to_vmem [thread:$0]  %s1086_s0, 128, %s23_s12, [#allocation3]  }
  0x25   :  { %s901_s26 = scalar_lea.hbm %s1089_s3, 4096 }
  0x26   :  { %p902_p2 = scmp.ne.s32.totalorder %s1089_s3, %s901_s26  ;;  %p905_p3 = scmp.lt.u32.totalorder %s901_s26, %s1089_s3 }
  0x28   :  { %p907_p4 = pnand %p905_p3, %p902_p2 }
  0x2a   :  { %910 = shalt.err (!%p907_p4)
}
  0x2b   :  { %s911_s7 = scalar_lea.vmem %s46_s14, 4096  ;;  %p916_p6 = scmp.lt.s32.totalorder %s46_s14, %s46_s14 }
  0x2c   :  { %p912_p5 = scmp.ne.s32.totalorder %s46_s14, %s911_s7  ;;  %p917_p7 = scmp.lt.s32.totalorder %s911_s7, %s911_s7 }
  0x2e   :  { %p918_p8 = por %p917_p7, %p916_p6 }
  0x30   :  { %p919_p9 = pnand %p918_p8, %p912_p5 }
  0x32   :  { %922 = shalt.err (!%p919_p9)
}
  0x33   :  { %s980_s0 = smov 64   ;;  %s981_s8 = smov 4  }
  0x34   :  { %51 = dma.hbm_to_vmem [thread:$0]  %s1089_s3, 4096, %s46_s14, [#allocation6], %s980_s0, %s980_s0, %s981_s8  }
  0x35   :  { %967 = dma.done.wait [#allocation3], 128  }
  0x36   :  { %968 = vsyncadd [#allocation3], 4294967168 }
  0x37   :  { %969 = dma.done.wait [#allocation6], 6144  }
  0x38   :  { %970 = vsyncadd [#allocation6], 4294961152  ;;  %v982_v0 = vmov 0   ;;  %v797_v1 = vld [vmem:[#allocation5 + $0x4] ss:$16 sps:$4 sm:$0xff]   ;;  %v64_v17 = vld [vmem:[#allocation2] sm:$0xff]  ;;  %v84_v51 = vlaneseq }
  0x39   :  { %220 = vmatprep.mubr.bf16.mxu0 %v982_v0  ;;  %261 = vmatprep.mubr.bf16.mxu1 %v982_v0  ;;  %v799_v2 = vld [vmem:[#allocation5 + $0xc] ss:$16 sps:$4 sm:$0xff]   ;;  %v801_v3 = vld [vmem:[#allocation5] ss:$16 sps:$4 sm:$0xff]   ;;  %v802_v4 = vld [vmem:[#allocation5 + $0x8] ss:$16 sps:$4 sm:$0xff]   ;;  %v65_v21 = vpack.c.bf16 %v64_v17, %v64_v17 }
  0x3a   :  { %188 = vmatprep.subr.bf16.mxu0 %v797_v1  ;;  %229 = vmatprep.subr.bf16.mxu1 %v799_v2  ;;  %v803_v5 = vld [vmem:[#allocation5 + $0x24] ss:$16 sps:$4 sm:$0xff]   ;;  %v805_v6 = vld [vmem:[#allocation5 + $0x2c] ss:$16 sps:$4 sm:$0xff]   ;;  %v807_v7 = vld [vmem:[#allocation5 + $0x20] ss:$16 sps:$4 sm:$0xff]  }
  0x3b   :  { %189 = vmatpush1.bf16.msra.mxu0 %v801_v3  ;;  %230 = vmatpush1.bf16.msra.mxu1 %v802_v4  ;;  %v808_v8 = vld [vmem:[#allocation5 + $0x28] ss:$16 sps:$4 sm:$0xff]   ;;  %v809_v9 = vld [vmem:[#allocation5 + $0x44] ss:$16 sps:$4 sm:$0xff]   ;;  %v811_v10 = vld [vmem:[#allocation5 + $0x4c] ss:$16 sps:$4 sm:$0xff]  }
  0x3c   :  { %190 = vmatprep.subr.bf16.mxu0 %v803_v5  ;;  %231 = vmatprep.subr.bf16.mxu1 %v805_v6  ;;  %v813_v11 = vld [vmem:[#allocation5 + $0x40] ss:$16 sps:$4 sm:$0xff]   ;;  %v814_v12 = vld [vmem:[#allocation5 + $0x48] ss:$16 sps:$4 sm:$0xff]   ;;  %v815_v13 = vld [vmem:[#allocation5 + $0x64] ss:$16 sps:$4 sm:$0xff]  }
  0x3d   :  { %v817_v14 = vld [vmem:[#allocation5 + $0x6c] ss:$16 sps:$4 sm:$0xff]   ;;  %v819_v15 = vld [vmem:[#allocation5 + $0x60] ss:$16 sps:$4 sm:$0xff]   ;;  %v820_v16 = vld [vmem:[#allocation5 + $0x68] ss:$16 sps:$4 sm:$0xff]  }
  0x3e   :  { %v821_v18 = vld [vmem:[#allocation7 + $0x40] sm:$0xff]   ;;  %vm184_vm0 = vcmask 523264   ;;  %v825_v23 = vld [vmem:[#allocation7 + $0x48] sm:$0xff]   ;;  %v829_v27 = vld [vmem:[#allocation7 + $0x50] sm:$0xff]   ;;  %v85_v52 = vshrl.u32 %v84_v51, 7 }
  0x3f   :  { %191 = vmatpush1.bf16.msra.mxu0 %v807_v7  ;;  %232 = vmatpush1.bf16.msra.mxu1 %v808_v8  ;;  %v822_v19 = vld [vmem:[#allocation7 + $0xc0] sm:$0xff]   ;;  %v826_v24 = vld [vmem:[#allocation7 + $0xc8] sm:$0xff]   ;;  %v830_v28 = vld [vmem:[#allocation7 + $0xd0] sm:$0xff]  }
  0x40   :  { %192 = vmatprep.subr.bf16.mxu0 %v809_v9  ;;  %233 = vmatprep.subr.bf16.mxu1 %v811_v10  ;;  %v823_v20 = vld [vmem:[#allocation7] sm:$0xff]   ;;  %v827_v25 = vld [vmem:[#allocation7 + $0x8] sm:$0xff]   ;;  %v831_v29 = vld [vmem:[#allocation7 + $0x10] sm:$0xff]   ;;  %v86_v53 = vsub.s32 0, %v85_v52  ;;  %v94_v54 = vsub.s32 2, %v85_v52  ;;  %v90_v56 = vsub.s32 1, %v85_v52 }
  0x41   :  { %v824_v22 = vld [vmem:[#allocation7 + $0x80] sm:$0xff]   ;;  %v828_v26 = vld [vmem:[#allocation7 + $0x88] sm:$0xff]   ;;  %v832_v30 = vld [vmem:[#allocation7 + $0x90] sm:$0xff]   ;;  %v98_v57 = vsub.s32 3, %v85_v52 }
  0x42   :  { %v833_v31 = vld [vmem:[#allocation7 + $0x58] sm:$0xff]   ;;  %v837_v35 = vld [vmem:[#allocation7 + $0x60] sm:$0xff]   ;;  %v841_v39 = vld [vmem:[#allocation7 + $0x68] sm:$0xff]  }
  0x43   :  { %193 = vmatpush1.bf16.msra.mxu0 %v813_v11  ;;  %234 = vmatpush1.bf16.msra.mxu1 %v814_v12  ;;  %v834_v32 = vld [vmem:[#allocation7 + $0xd8] sm:$0xff]   ;;  %v838_v36 = vld [vmem:[#allocation7 + $0xe0] sm:$0xff]   ;;  %v842_v40 = vld [vmem:[#allocation7 + $0xe8] sm:$0xff]  }
  0x44   :  { %194 = vmatprep.subr.bf16.mxu0 %v815_v13  ;;  %235 = vmatprep.subr.bf16.mxu1 %v817_v14  ;;  %v835_v33 = vld [vmem:[#allocation7 + $0x18] sm:$0xff]   ;;  %v839_v37 = vld [vmem:[#allocation7 + $0x20] sm:$0xff]   ;;  %v843_v41 = vld [vmem:[#allocation7 + $0x28] sm:$0xff]  }
  0x45   :  { %v836_v34 = vld [vmem:[#allocation7 + $0x98] sm:$0xff]   ;;  %v840_v38 = vld [vmem:[#allocation7 + $0xa0] sm:$0xff]   ;;  %v844_v42 = vld [vmem:[#allocation7 + $0xa8] sm:$0xff]  }
  0x46   :  { %v845_v43 = vld [vmem:[#allocation7 + $0x70] sm:$0xff]   ;;  %v849_v47 = vld [vmem:[#allocation7 + $0x78] sm:$0xff]  }
  0x47   :  { %195 = vmatpush1.bf16.msra.mxu0 %v819_v15  ;;  %236 = vmatpush1.bf16.msra.mxu1 %v820_v16  ;;  %v846_v44 = vld [vmem:[#allocation7 + $0xf0] sm:$0xff]   ;;  %v850_v48 = vld [vmem:[#allocation7 + $0xf8] sm:$0xff]  }
  0x48   :  { %743 = vmatprep.subr.bf16.mxu0 %v821_v18  ;;  %765 = vmatprep.subr.bf16.mxu1 %v822_v19  ;;  %v847_v45 = vld [vmem:[#allocation7 + $0x30] sm:$0xff]   ;;  %v851_v49 = vld [vmem:[#allocation7 + $0x38] sm:$0xff]  }
  0x49   :  { %v848_v46 = vld [vmem:[#allocation7 + $0xb0] sm:$0xff]   ;;  %v852_v50 = vld [vmem:[#allocation7 + $0xb8] sm:$0xff]  }
  0x4a   :  { %704 = vmatmul.mubr.msk.bf16.vlgmr.msra.gmra.mrb[0].mxu0 %vm184_vm0, %v65_v21  ;;  %705 = vmatmul.mubr.msk.bf16.vlgmr.msra.gmra.mrb[0].mxu1 %vm184_vm0, %v65_v21  ;;  %v82_v55 = vld [vmem:[%s1088_s2] sm:$0xf]  ;;  %s983_s2 = smov [#allocation9]  }
  0x4b   :  { %744 = vmatpush3.bf16.msra.mxu0 %v823_v20  ;;  %766 = vmatpush3.bf16.msra.mxu1 %v824_v22  ;;  %v87_v58 = vrot.slane %v82_v55, %v86_v53  ;;  %v95_v59 = vrot.slane %v82_v55, %v94_v54  ;;  %v91_v60 = vrot.slane %v82_v55, %v90_v56  ;;  %s674_s12 = sshll.u32 %s983_s2, 4  ;;  %s675_s12 = int_to_ptr.vmem [resolvable:$true] %s674_s12 }
  0x4c   :  { %745 = vmatprep.subr.bf16.mxu0 %v825_v23  ;;  %767 = vmatprep.subr.bf16.mxu1 %v826_v24  ;;  %v99_v61 = vrot.slane %v82_v55, %v98_v57  ;;  %s923_s13 = scalar_lea.vmem %s675_s12, 256  ;;  %p928_p11 = scmp.lt.s32.totalorder %s675_s12, %s675_s12 }
  0x4d   :  { %p924_p10 = scmp.ne.s32.totalorder %s675_s12, %s923_s13  ;;  %p929_p12 = scmp.lt.s32.totalorder %s923_s13, %s923_s13 }
  0x4f   :  { %746 = vmatpush3.bf16.msra.mxu0 %v827_v25  ;;  %768 = vmatpush3.bf16.msra.mxu1 %v828_v26  ;;  %p930_p13 = por %p929_p12, %p928_p11 }
  0x50   :  { %747 = vmatprep.subr.bf16.mxu0 %v829_v27  ;;  %769 = vmatprep.subr.bf16.mxu1 %v830_v28 }
  0x51   :  { %p931_p0 = pnand %p930_p13, %p924_p10 }
  0x53   :  { %748 = vmatpush3.bf16.msra.mxu0 %v831_v29  ;;  %770 = vmatpush3.bf16.msra.mxu1 %v832_v30 }
  0x54   :  { %749 = vmatprep.subr.bf16.mxu0 %v833_v31  ;;  %771 = vmatprep.subr.bf16.mxu1 %v834_v32 }
  0x57   :  { %750 = vmatpush3.bf16.msra.mxu0 %v835_v33  ;;  %772 = vmatpush3.bf16.msra.mxu1 %v836_v34 }
  0x58   :  { %751 = vmatprep.subr.bf16.mxu0 %v837_v35  ;;  %773 = vmatprep.subr.bf16.mxu1 %v838_v36 }
  0x5b   :  { %752 = vmatpush3.bf16.msra.mxu0 %v839_v37  ;;  %774 = vmatpush3.bf16.msra.mxu1 %v840_v38 }
  0x5c   :  { %753 = vmatprep.subr.bf16.mxu0 %v841_v39  ;;  %775 = vmatprep.subr.bf16.mxu1 %v842_v40 }
  0x5f   :  { %754 = vmatpush3.bf16.msra.mxu0 %v843_v41  ;;  %776 = vmatpush3.bf16.msra.mxu1 %v844_v42 }
  0x60   :  { %755 = vmatprep.subr.bf16.mxu0 %v845_v43  ;;  %777 = vmatprep.subr.bf16.mxu1 %v846_v44 }
  0x63   :  { %756 = vmatpush3.bf16.msra.mxu0 %v847_v45  ;;  %778 = vmatpush3.bf16.msra.mxu1 %v848_v46 }
  0x64   :  { %757 = vmatprep.subr.bf16.mxu0 %v849_v47  ;;  %779 = vmatprep.subr.bf16.mxu1 %v850_v48 }
  0x67   :  { %758 = vmatpush3.bf16.msra.mxu0 %v851_v49  ;;  %780 = vmatpush3.bf16.msra.mxu1 %v852_v50 }
 0x11d   :  { %v222_v62 = vpop.f32.mrb[0].mxu0  ;;  %v263_v63 = vpop.f32.mrb[0].mxu1 }
 0x11e   :  { %v223_v0 = vadd.f32 %v222_v62, %v87_v58  ;;  %v264_v1 = vadd.f32 %v263_v63, %v95_v59  ;;  %v224_v2 = vpop.f32.mrb[1].mxu0  ;;  %v265_v3 = vpop.f32.mrb[1].mxu1 }
 0x11f   :  { %v225_v4 = vadd.f32 %v224_v2, %v91_v60  ;;  %v266_v5 = vadd.f32 %v265_v3, %v99_v61  ;;  %v226_v6 = vpop.f32.mrb[2].mxu0  ;;  %v267_v7 = vpop.f32.mrb[2].mxu1 }
 0x120   :  { %v270_v8 = vmul.f32 %v223_v0, %v223_v0  ;;  %v312_v9 = vpack.c.bf16 %v264_v1, %v264_v1  ;;  %v227_v10 = vpop.f32.mrb[3].mxu0  ;;  %v268_v11 = vpop.f32.mrb[3].mxu1  ;;  %v272_v15 = vmul.f32 %v264_v1, %v264_v1  ;;  %v310_v16 = vpack.c.bf16 %v223_v0, %v223_v0 }
 0x121   :  { %v271_v12 = vmul.f32 %v225_v4, %v225_v4  ;;  %v311_v13 = vpack.c.bf16 %v225_v4, %v225_v4  ;;  %v313_v14 = vpack.c.bf16 %v266_v5, %v266_v5  ;;  %v273_v18 = vmul.f32 %v266_v5, %v266_v5 }
 0x123   :  { %609 = vmatprep.mubr.bf16.mxu0 %v311_v13  ;;  %649 = vmatprep.mubr.bf16.mxu1 %v313_v14  ;;  %v274_v17 = vadd.f32 %v271_v12, %v270_v8 }
 0x124   :  { %610 = vmatmul.mubr.bf16.vlgmr.msra.gmra.mrb[4].mxu0 %v310_v16  ;;  %650 = vmatmul.mubr.bf16.vlgmr.msra.gmra.mrb[4].mxu1 %v312_v9 }
 0x125   :  { %v275_v19 = vadd.f32 %v274_v17, %v272_v15 }
 0x127   :  { %v276_v20 = vadd.f32 %v275_v19, %v273_v18 }
 0x129   :  { %277 = vadd.xlane.f32.xlu0 %v276_v20 }
 0x1b6   :  { %v278_v21 = vpop.xlane.xlu0 %277 }
 0x1b7   :  { %853 = vrsqrt.f32 %v278_v21  ;;  %vm281_vm1 = vcmp.eq.f32.partialorder %v278_v21, inf  ;;  %v284_v24 = vand.u32 2147483648, %v278_v21  ;;  %vm283_vm2 = vcmp.eq.f32.partialorder %v278_v21, 0.0 }
 0x1c1   :  { %v854_v22 = vpop.eup %853 }
 0x1c2   :  { %v280_v23 = vmul.f32 %v854_v22, %v278_v21 }
 0x1c4   :  { %v282_v25 = vsel %vm281_vm1, %v278_v21, %v280_v23 }
 0x1c5   :  { %v285_v26 = vsel %vm283_vm2, %v284_v24, %v282_v25 }
 0x1c6   :  { %v286_v27 = vadd.f32 1e-08, %v285_v26 }
 0x1c8   :  { %855 = vrcp.f32 %v286_v27 }
 0x1d2   :  { %v856_v28 = vpop.eup %855 }
 0x1d3   :  { %v288_v29 = vmul.f32 %v856_v28, %v223_v0  ;;  %v289_v30 = vmul.f32 %v856_v28, %v225_v4  ;;  %v290_v31 = vmul.f32 %v856_v28, %v264_v1  ;;  %v291_v32 = vmul.f32 %v856_v28, %v266_v5 }
 0x1d5   :  { %v741_v33 = vpack.c.bf16 %v289_v30, %v288_v29  ;;  %v742_v34 = vpack.c.bf16 %v291_v32, %v290_v31 }
 0x1d7   :  { %308 = vst [vmem:[#allocation9] sm:$0xff] %v741_v33  ;;  %309 = vst [vmem:[#allocation9 + $0x8] sm:$0xff] %v742_v34 }
 0x1d8   :  { %934 = shalt.err (!%p931_p0)
}
 0x1d9   :  { %s935_s16 = scalar_lea.hbm %s1092_s6, 256 }
 0x1da   :  { %p936_p1 = scmp.ne.s32.totalorder %s1092_s6, %s935_s16  ;;  %p939_p2 = scmp.lt.u32.totalorder %s935_s16, %s1092_s6 }
 0x1dc   :  { %p941_p3 = pnand %p939_p2, %p936_p1 }
 0x1de   :  { %944 = shalt.err (!%p941_p3)
}
 0x1df   :  { %677 = dma.vmem_to_hbm [thread:$0]  %s675_s12, 256, %s1092_s6, [#allocation10]   ;;  %v708_v37 = vld [vmem:[%s1090_s4] ss:$0 sm:$0xff] }
 0x1e0   :  { %s984_s24 = smov [#allocation8]  }
 0x1e1   :  { %s664_s25 = sshll.u32 %s984_s24, 4  ;;  %s665_s25 = int_to_ptr.vmem [resolvable:$true] %s664_s25 }
 0x1e2   :  { %s945_s6 = scalar_lea.vmem %s665_s25, 128  ;;  %p950_p5 = scmp.lt.s32.totalorder %s665_s25, %s665_s25 }
 0x1e3   :  { %p946_p4 = scmp.ne.s32.totalorder %s665_s25, %s945_s6  ;;  %p951_p6 = scmp.lt.s32.totalorder %s945_s6, %s945_s6 }
 0x1e5   :  { %p952_p7 = por %p951_p6, %p950_p5 }
 0x1e7   :  { %p953_p8 = pnand %p952_p7, %p946_p4 }
 0x1f7   :  { %v759_v35 = vpop.f32.mrb[4].mxu0  ;;  %v781_v36 = vpop.f32.mrb[4].mxu1 }
 0x1f8   :  { %v760_v38 = vpop.f32.mrb[5].mxu0  ;;  %v782_v39 = vpop.f32.mrb[5].mxu1 }
 0x1f9   :  { %v761_v40 = vadd.f32 %v760_v38, %v759_v35  ;;  %v783_v41 = vadd.f32 %v782_v39, %v781_v36  ;;  %v762_v42 = vpop.f32.mrb[6].mxu0  ;;  %v784_v43 = vpop.f32.mrb[6].mxu1 }
 0x1fa   :  { %v763_v44 = vpop.f32.mrb[7].mxu0  ;;  %v785_v45 = vpop.f32.mrb[7].mxu1 }
 0x1fb   :  { %v612_v46 = vadd.f32 %v761_v40, %v708_v37 }
 0x1fd   :  { %v652_v47 = vadd.f32 %v783_v41, %v612_v46 }
 0x1ff   :  { %657 = vst [vmem:[#allocation8] sm:$0xff] %v652_v47 }
 0x200   :  { %956 = shalt.err (!%p953_p8)
}
 0x201   :  { %s957_s27 = scalar_lea.hbm %s1091_s5, 128 }
 0x202   :  { %p958_p9 = scmp.ne.s32.totalorder %s1091_s5, %s957_s27  ;;  %p961_p10 = scmp.lt.u32.totalorder %s957_s27, %s1091_s5 }
 0x204   :  { %p963_p11 = pnand %p961_p10, %p958_p9 }
 0x206   :  { %966 = shalt.err (!%p963_p11)
}
 0x207   :  { %667 = dma.vmem_to_hbm [thread:$0]  %s665_s25, 128, %s1091_s5, [#allocation4]  }
 0x208   :  { %971 = dma.done.wait [#allocation4], 128  }
 0x209   :  { %972 = vsyncadd [#allocation4], 4294967168 }
 0x20a   :  { %973 = dma.done.wait [#allocation10], 256  }
 0x20b   :  { %974 = vsyncadd [#allocation10], 4294967040 }
 0x20c   :  { %684 = vsyncpa [#allocation3], 1 }
 0x20d   :  { %685 = vsyncpa [#allocation6], 1 }
 0x20e   :  { %686 = vsyncpa [#allocation4], 1 }
 0x20f   :  { %687 = vsyncpa [#allocation10], 1 }

</bundles_post_ra>
